<compile_context>
chip_gen: v6e
topology: v6e:2x2x1
jax: 0.10.0
libtpu: 0.0.40
codegen_flags: <defaults>
</compile_context>

<pallas_src>
import functools

import jax
import jax.numpy as jnp
from jax.experimental import pallas as pl
from jax.experimental.pallas import tpu as pltpu


def _round_up(x, m):
    return (x + m - 1) // m * m


def _cdiv(a, b):
    return -(-a // b)


def _vmem_budget_bytes():
    """Physical VMEM minus headroom for compiler scratch / pipeline buffers."""
    try:
        cap = int(pltpu.get_tpu_info().vmem_capacity_bytes)
    except Exception:
        cap = 64 * 1024 * 1024            # conservative: v7x per-core VMEM
    cap = min(max(cap, 32 * 1024 * 1024), 128 * 1024 * 1024)
    return max(cap - 16 * 1024 * 1024, cap // 2)


def _block_spec(shape, index_map, buffer_count=None):
    """BlockSpec with optional pipeline_mode, degrading gracefully if unsupported."""
    if buffer_count is not None:
        try:
            return pl.BlockSpec(shape, index_map,
                                pipeline_mode=pl.Buffered(buffer_count))
        except TypeError:
            pass
    return pl.BlockSpec(shape, index_map)


def _choose_tiles(m, d_model, d_ff, comp_bytes, out_bytes, budget, sublane,
                  tile_m, tile_ff):
    """Pick (tm, tf, ff_pad) from the VMEM budget."""
    bias_bytes = 4 * (d_ff + d_model)

    def row_bytes(tf, n_x_buf):
        # Per row of a tile: x copies + double-buffered output + fp32 acc
        # + fp32 hidden slab and its cast.
        return (d_model * (n_x_buf * comp_bytes + 2 * out_bytes + 4)
                + tf * (4 + comp_bytes))

    force_stream = tile_ff is not None and tile_ff < d_ff
    resident_bytes = 2 * d_model * d_ff * comp_bytes + bias_bytes

    if not force_stream and resident_bytes <= 0.6 * budget:
        # Weights fully resident in VMEM: DMA'd once, grid = (M_tiles, 1).
        tf, ff_pad = d_ff, d_ff
        tm = max(budget - resident_bytes, 0) // row_bytes(tf, 2)
    else:
        # Stream d_ff tiles; prefer a lane-aligned exact divisor of d_ff.
        want = max(128, _round_up(tile_ff if tile_ff is not None else 512, 128))
        tf = 0
        for cand in range(min(want, _round_up(d_ff, 128)), 0, -128):
            if d_ff % cand == 0:
                tf = cand
                break
        if tf == 0:                       # rare: no lane-aligned divisor -> pad
            tf = min(want, _round_up(d_ff, 128))
        ff_pad = _round_up(d_ff, tf)
        stream_bytes = 2 * (2 * d_model * tf * comp_bytes) + bias_bytes
        tm = max(budget - stream_bytes, 0) // row_bytes(tf, 1)

    if tile_m is not None:
        tm = min(tm, tile_m)
    tm = min(tm, _round_up(m, sublane), 2048)
    tm = max(sublane, tm // sublane * sublane)

    # v7x megacore: give the "parallel" M axis >= 2 tiles when possible.
    if _cdiv(m, tm) < 2:
        half = _round_up(max(_cdiv(m, 2), 1), sublane)
        if half < tm:
            tm = half
    return tm, tf, ff_pad


def _ffn_kernel(x_ref, w1_ref, b1_ref, w2_ref, b2_ref, o_ref, *scratch,
                single_ff_step):
    """One (row-tile, d_ff-tile) step of the fused FFN."""
    x = x_ref[...]                                              # (tm, d_model)
    h = jnp.dot(x, w1_ref[...], preferred_element_type=jnp.float32)
    h = jnp.maximum(h + b1_ref[...], 0.0)                       # bias + ReLU, fp32 VPU
    # TODO(synk): training-mode dropout would mask `h` here via pltpu.prng_seed +
    # pltpu.prng_random_bits; eval-mode nn.Dropout is the identity.
    y = jnp.dot(h.astype(w2_ref.dtype), w2_ref[...],
                preferred_element_type=jnp.float32)             # (tm, d_model) fp32

    if single_ff_step:
        o_ref[...] = (y + b2_ref[...]).astype(o_ref.dtype)
        return

    # d_ff is a reduction grid axis: accumulate across f steps.  When the output
    # dtype is fp32 we accumulate directly into the resident output block
    # (no scratch); otherwise an fp32 VMEM scratch is provided.
    acc_ref = scratch[0] if scratch else o_ref
    f = pl.program_id(1)

    @pl.when(f == 0)
    def _init():
        acc_ref[...] = jnp.zeros_like(acc_ref)

    acc_ref[...] += y

    @pl.when(f == pl.num_programs(1) - 1)
    def _finalize():
        o_ref[...] = (acc_ref[...] + b2_ref[...]).astype(o_ref.dtype)


@functools.partial(jax.jit, static_argnames=("tile_m", "tile_ff", "compute_dtype",
                                             "dropout_rate", "deterministic"))
def feed_forward(x, w1, b1, w2, b2, *, tile_m=None, tile_ff=None,
                 compute_dtype=jnp.bfloat16, dropout_rate=0.0, deterministic=True):
    """x: [..., d_model] -> [..., d_model]  (PyTorch FeedForward.forward, eval mode)."""
    if (not deterministic) and dropout_rate > 0.0:
        # TODO(synk): implement training-mode dropout with the in-kernel PRNG.
        raise NotImplementedError("training-mode dropout is not implemented")

    orig_shape = x.shape
    out_dtype = x.dtype
    d_model = orig_shape[-1]
    d_ff = w1.shape[1]

    x2d = x.reshape(-1, d_model)
    m = x2d.shape[0]

    cdt = jnp.dtype(compute_dtype) if compute_dtype is not None else jnp.dtype(out_dtype)
    if x2d.dtype != cdt:
        x2d = x2d.astype(cdt)
    if w1.dtype != cdt:
        w1 = w1.astype(cdt)
    if w2.dtype != cdt:
        w2 = w2.astype(cdt)

    comp_bytes = cdt.itemsize
    out_bytes = jnp.dtype(out_dtype).itemsize
    sublane = max(8, 32 // comp_bytes)          # fp32:8, bf16:16, int8/fp8:32

    budget = _vmem_budget_bytes()
    tm, tf, ff_pad = _choose_tiles(m, d_model, d_ff, comp_bytes, out_bytes,
                                   budget, sublane, tile_m, tile_ff)

    if ff_pad != d_ff:
        # Rare fallback (no lane-aligned divisor of d_ff); zero-padded hidden
        # units contribute nothing to the result.
        w1 = jnp.pad(w1, ((0, 0), (0, ff_pad - d_ff)))
        b1 = jnp.pad(b1, ((0, ff_pad - d_ff),))
        w2 = jnp.pad(w2, ((0, ff_pad - d_ff), (0, 0)))

    b1_2d = b1.reshape(1, ff_pad).astype(jnp.float32)
    b2_2d = b2.reshape(1, d_model).astype(jnp.float32)

    n_m_tiles = _cdiv(m, tm)                    # ragged last M tile handled by Pallas
    n_ff_tiles = ff_pad // tf
    weights_resident = n_ff_tiles == 1

    need_scratch = (n_ff_tiles > 1) and (jnp.dtype(out_dtype) != jnp.dtype(jnp.float32))
    scratch_shapes = [pltpu.VMEM((tm, d_model), jnp.float32)] if need_scratch else []

    w_buf = 1 if weights_resident else None     # resident weights: single buffer
    x_buf = 1 if n_ff_tiles > 1 else None       # x block index is f-invariant
    in_specs = [
        _block_spec((tm, d_model), lambda i, f: (i, 0), x_buf),      # x rows
        _block_spec((d_model, tf), lambda i, f: (0, f), w_buf),      # W1 column-tile
        _block_spec((1, tf), lambda i, f: (0, f), w_buf),            # b1 tile
        _block_spec((tf, d_model), lambda i, f: (f, 0), w_buf),      # W2 row-tile
        _block_spec((1, d_model), lambda i, f: (0, 0), w_buf),       # b2
    ]
    out_spec = pl.BlockSpec((tm, d_model), lambda i, f: (i, 0))

    w_hbm_bytes = 2 * d_model * ff_pad * comp_bytes * (1 if weights_resident else n_m_tiles)
    cost = pl.CostEstimate(
        flops=4 * m * d_model * ff_pad,
        transcendentals=0,
        bytes_accessed=int(m * d_model * (comp_bytes + out_bytes)
                           + w_hbm_bytes + 4 * (ff_pad + d_model)),
    )

    out = pl.pallas_call(
        functools.partial(_ffn_kernel, single_ff_step=weights_resident),
        out_shape=jax.ShapeDtypeStruct((m, d_model), out_dtype),
        grid_spec=pltpu.PrefetchScalarGridSpec(
            num_scalar_prefetch=0,
            grid=(n_m_tiles, n_ff_tiles),
            in_specs=in_specs,
            out_specs=out_spec,
            scratch_shapes=scratch_shapes,
        ),
        compiler_params=pltpu.CompilerParams(
            dimension_semantics=("parallel", "arbitrary"),
            vmem_limit_bytes=budget,
        ),
        cost_estimate=cost,
    )(x2d, w1, b1_2d, w2, b2_2d)

    return out.reshape(orig_shape)


def init_params(key, d_model, d_ff, dtype=jnp.float32):
    """nn.Linear-style init (U(-1/sqrt(fan_in), 1/sqrt(fan_in))), weights as [in, out]."""
    k1, k2, k3, k4 = jax.random.split(key, 4)
    bound1 = 1.0 / (d_model ** 0.5)
    bound2 = 1.0 / (d_ff ** 0.5)
    w1 = jax.random.uniform(k1, (d_model, d_ff), jnp.float32, -bound1, bound1).astype(dtype)
    b1 = jax.random.uniform(k2, (d_ff,), jnp.float32, -bound1, bound1).astype(dtype)
    w2 = jax.random.uniform(k3, (d_ff, d_model), jnp.float32, -bound2, bound2).astype(dtype)
    b2 = jax.random.uniform(k4, (d_model,), jnp.float32, -bound2, bound2).astype(dtype)
    return w1, b1, w2, b2


def _reference(x, w1, b1, w2, b2, compute_dtype=None):
    xs = x.reshape(-1, x.shape[-1])
    if compute_dtype is not None:
        xs = xs.astype(compute_dtype)
        w1 = w1.astype(compute_dtype)
        w2 = w2.astype(compute_dtype)
    h = jnp.dot(xs, w1, preferred_element_type=jnp.float32) + b1.astype(jnp.float32)
    h = jnp.maximum(h, 0.0)
    if compute_dtype is not None:
        h = h.astype(compute_dtype)
    y = jnp.dot(h, w2, preferred_element_type=jnp.float32) + b2.astype(jnp.float32)
    return y.reshape(x.shape).astype(x.dtype)


if __name__ == "__main__":
    # Case 1: default bf16 compute, resident-weight path (grid = (M_tiles, 1)).
    batch, seq, d_model, d_ff = 2, 8, 128, 256
    kx, kp = jax.random.split(jax.random.PRNGKey(0))
    x = jax.random.normal(kx, (batch, seq, d_model), jnp.float32)
    w1, b1, w2, b2 = init_params(kp, d_model, d_ff)
    out = jax.block_until_ready(feed_forward(x, w1, b1, w2, b2))
    ref = _reference(x, w1, b1, w2, b2, compute_dtype=jnp.bfloat16)
    assert out.shape == x.shape and out.dtype == x.dtype
    assert jnp.allclose(out, ref, atol=2e-2, rtol=2e-2)

    # Case 2: fp32 compute, ragged M (15 rows), tiled d_ff -> accumulate directly
    # into the fp32 output block (no scratch) across the "arbitrary" axis.
    batch, seq, d_model, d_ff = 3, 5, 128, 384
    kx, kp = jax.random.split(jax.random.PRNGKey(1))
    x = jax.random.normal(kx, (batch, seq, d_model), jnp.float32)
    w1, b1, w2, b2 = init_params(kp, d_model, d_ff)
    out = jax.block_until_ready(
        feed_forward(x, w1, b1, w2, b2, tile_ff=128, compute_dtype=jnp.float32))
    ref = _reference(x, w1, b1, w2, b2)
    assert out.shape == x.shape
    assert jnp.allclose(out, ref, atol=1e-2, rtol=1e-2)

    # Case 3: bf16 activations/output, tiled d_ff -> fp32 VMEM scratch accumulator.
    batch, seq, d_model, d_ff = 2, 16, 128, 256
    kx, kp = jax.random.split(jax.random.PRNGKey(2))
    x = jax.random.normal(kx, (batch, seq, d_model), jnp.float32).astype(jnp.bfloat16)
    w1, b1, w2, b2 = init_params(kp, d_model, d_ff, dtype=jnp.bfloat16)
    out = jax.block_until_ready(feed_forward(x, w1, b1, w2, b2, tile_ff=128))
    ref = _reference(x, w1, b1, w2, b2, compute_dtype=jnp.bfloat16)
    assert out.dtype == jnp.bfloat16
    assert jnp.allclose(out.astype(jnp.float32), ref.astype(jnp.float32),
                        atol=5e-2, rtol=5e-2)

    print("KERNEL_OK")
</pallas_src>

<mosaic_0001>
module attributes {stable_mosaic.version = 11 : i64} {
  func.func @_ffn_kernel(%arg0: i32, %arg1: i32, %arg2: memref<16x128xbf16, #tpu.memory_space<vmem>>, %arg3: memref<128x256xbf16, #tpu.memory_space<vmem>>, %arg4: memref<1x256xf32, #tpu.memory_space<vmem>>, %arg5: memref<256x128xbf16, #tpu.memory_space<vmem>>, %arg6: memref<1x128xf32, #tpu.memory_space<vmem>>, %arg7: memref<16x128xf32, #tpu.memory_space<vmem>>) attributes {dimension_semantics = [#tpu.dimension_semantics<parallel>, #tpu.dimension_semantics<arbitrary>], iteration_bounds = array<i64: 1, 1>, scalar_prefetch = 0 : i64, scratch_operands = 0 : i64, tpu.core_type = #tpu.core_type<tc>, window_params = [{transform_indices = @transform_0, window_bounds = array<i64: 16, 128>}, {pipeline_mode = #tpu.pipeline_mode<synchronous>, transform_indices = @transform_1, window_bounds = array<i64: 128, 256>}, {pipeline_mode = #tpu.pipeline_mode<synchronous>, transform_indices = @transform_2, window_bounds = array<i64: 1, 256>}, {pipeline_mode = #tpu.pipeline_mode<synchronous>, transform_indices = @transform_3, window_bounds = array<i64: 256, 128>}, {pipeline_mode = #tpu.pipeline_mode<synchronous>, transform_indices = @transform_4, window_bounds = array<i64: 1, 128>}, {transform_indices = @transform_5, window_bounds = array<i64: 16, 128>}]} {
    %c0 = arith.constant 0 : index
    %c0_0 = arith.constant 0 : index
    %0 = vector.load %arg2[%c0, %c0_0] : memref<16x128xbf16, #tpu.memory_space<vmem>>, vector<16x128xbf16>
    %c0_1 = arith.constant 0 : index
    %c0_2 = arith.constant 0 : index
    %1 = vector.load %arg3[%c0_1, %c0_2] : memref<128x256xbf16, #tpu.memory_space<vmem>>, vector<128x256xbf16>
    %cst = arith.constant dense<0.000000e+00> : vector<16x256xf32>
    %2 = tpu.matmul %0, %1, %cst {dimension_numbers = #tpu.dot_dimension_numbers<[1], [0], [0], [1], [0, 0, 1, 1], [], []>} : vector<16x128xbf16>, vector<128x256xbf16>, vector<16x256xf32> -> vector<16x256xf32>
    %c0_3 = arith.constant 0 : index
    %c0_4 = arith.constant 0 : index
    %3 = vector.load %arg4[%c0_3, %c0_4] : memref<1x256xf32, #tpu.memory_space<vmem>>, vector<1x256xf32>
    %4 = vector.broadcast %3 : vector<1x256xf32> to vector<16x256xf32>
    %5 = arith.addf %2, %4 : vector<16x256xf32>
    %cst_5 = arith.constant 0.000000e+00 : f32
    %6 = vector.broadcast %cst_5 : f32 to vector<16x256xf32>
    %7 = arith.maximumf %5, %6 : vector<16x256xf32>
    %8 = arith.truncf %7 : vector<16x256xf32> to vector<16x256xbf16>
    %c0_6 = arith.constant 0 : index
    %c0_7 = arith.constant 0 : index
    %9 = vector.load %arg5[%c0_6, %c0_7] : memref<256x128xbf16, #tpu.memory_space<vmem>>, vector<256x128xbf16>
    %cst_8 = arith.constant dense<0.000000e+00> : vector<16x128xf32>
    %10 = tpu.matmul %8, %9, %cst_8 {dimension_numbers = #tpu.dot_dimension_numbers<[1], [0], [0], [1], [0, 0, 1, 1], [], []>} : vector<16x256xbf16>, vector<256x128xbf16>, vector<16x128xf32> -> vector<16x128xf32>
    %c0_9 = arith.constant 0 : index
    %c0_10 = arith.constant 0 : index
    %11 = vector.load %arg6[%c0_9, %c0_10] : memref<1x128xf32, #tpu.memory_space<vmem>>, vector<1x128xf32>
    %12 = vector.broadcast %11 : vector<1x128xf32> to vector<16x128xf32>
    %13 = arith.addf %10, %12 : vector<16x128xf32>
    %c0_11 = arith.constant 0 : index
    %c0_12 = arith.constant 0 : index
    %14 = vector.load %arg7[%c0_11, %c0_12] : memref<16x128xf32, #tpu.memory_space<vmem>>, vector<16x128xf32>
    tpu.vector_store %arg7[%c0_11, %c0_12], %13 {strides = array<i32>} : memref<16x128xf32, #tpu.memory_space<vmem>>, vector<16x128xf32>,
    return
  }
  func.func @transform_0(%arg0: i32, %arg1: i32) -> (i32, i32) {
    %c0_i32 = arith.constant 0 : i32
    %c0_i32_0 = arith.constant 0 : i32
    return %arg0, %c0_i32 : i32, i32
  }
  func.func @transform_1(%arg0: i32, %arg1: i32) -> (i32, i32) {
    %c0_i32 = arith.constant 0 : i32
    %c0_i32_0 = arith.constant 0 : i32
    return %c0_i32, %arg1 : i32, i32
  }
  func.func @transform_2(%arg0: i32, %arg1: i32) -> (i32, i32) {
    %c0_i32 = arith.constant 0 : i32
    %c0_i32_0 = arith.constant 0 : i32
    return %c0_i32, %arg1 : i32, i32
  }
  func.func @transform_3(%arg0: i32, %arg1: i32) -> (i32, i32) {
    %c0_i32 = arith.constant 0 : i32
    %c0_i32_0 = arith.constant 0 : i32
    return %arg1, %c0_i32 : i32, i32
  }
  func.func @transform_4(%arg0: i32, %arg1: i32) -> (i32, i32) {
    %c0_i32 = arith.constant 0 : i32
    %c0_i32_0 = arith.constant 0 : i32
    %c0_i32_1 = arith.constant 0 : i32
    return %c0_i32, %c0_i32_0 : i32, i32
  }
  func.func @transform_5(%arg0: i32, %arg1: i32) -> (i32, i32) {
    %c0_i32 = arith.constant 0 : i32
    %c0_i32_0 = arith.constant 0 : i32
    return %arg0, %c0_i32 : i32, i32
  }
}

</mosaic_0001>

<bundles_post_ra>
// kernel: feed_forward.1
= control target key start
LH: loop header
LB: loop body
LE: loop exit
PB: predicated region body
PF: predicated region fallthrough
CT: control target
= control target key end

     0   :  { %v504_v2 = vmov 0   ;;  %s646_s0 = inlined_call_operand.vmem [shape: bf16[16,128], index: 0, kind: input, shape index: {}]   ;;  %s647_s1 = inlined_call_operand.vmem [shape: bf16[128,256], index: 1, kind: input, shape index: {}]   ;;  %s648_s2 = inlined_call_operand.vmem [shape: f32[1,256], index: 2, kind: input, shape index: {}]   ;;  %s649_s3 = inlined_call_operand.vmem [shape: bf16[256,128], index: 3, kind: input, shape index: {}]   ;;  %s650_s4 = inlined_call_operand.vmem [shape: f32[1,128], index: 4, kind: input, shape index: {}]   ;;  %s651_s5 = inlined_call_operand.hbm [shape: f32[16,128], index: 5, kind: output, shape index: {}]  }
   0x1   :  { %v441_v0 = vld [vmem:[%s647_s1 + $0x74] ss:$8 sps:$4 sm:$0xff]   ;;  %v443_v1 = vld [vmem:[%s647_s1 + $0x70] ss:$8 sps:$4 sm:$0xff]   ;;  %170 = vmatprep.mubr.bf16.mxu0 %v504_v2  ;;  %v444_v3 = vld [vmem:[%s647_s1 + $0x64] ss:$8 sps:$4 sm:$0xff]  }
   0x2   :  { %138 = vmatprep.subr.bf16.mxu0 %v441_v0  ;;  %v446_v4 = vld [vmem:[%s647_s1 + $0x60] ss:$8 sps:$4 sm:$0xff]   ;;  %v447_v5 = vld [vmem:[%s647_s1 + $0x54] ss:$8 sps:$4 sm:$0xff]   ;;  %v449_v6 = vld [vmem:[%s647_s1 + $0x50] ss:$8 sps:$4 sm:$0xff]  }
   0x3   :  { %139 = vmatpush1.bf16.msra.mxu0 %v443_v1  ;;  %v450_v7 = vld [vmem:[%s647_s1 + $0x44] ss:$8 sps:$4 sm:$0xff]   ;;  %v452_v8 = vld [vmem:[%s647_s1 + $0x40] ss:$8 sps:$4 sm:$0xff]   ;;  %v453_v9 = vld [vmem:[%s647_s1 + $0x34] ss:$8 sps:$4 sm:$0xff]  }
   0x4   :  { %140 = vmatprep.subr.bf16.mxu0 %v444_v3  ;;  %v466_v10 = vld [vmem:[%s649_s3 + $0x78] sm:$0xff]   ;;  %v456_v13 = vld [vmem:[%s647_s1 + $0x24] ss:$8 sps:$4 sm:$0xff]   ;;  %v468_v14 = vld [vmem:[%s649_s3 + $0x70] sm:$0xff]  }
   0x5   :  { %v455_v11 = vld [vmem:[%s647_s1 + $0x30] ss:$8 sps:$4 sm:$0xff]   ;;  %415 = vmatprep.subr.bf16.mxu1 %v466_v10  ;;  %v470_v16 = vld [vmem:[%s649_s3 + $0x68] sm:$0xff]   ;;  %v459_v18 = vld [vmem:[%s647_s1 + $0x14] ss:$8 sps:$4 sm:$0xff]  }
   0x6   :  { %v467_v12 = vld [vmem:[%s649_s3 + $0x38] sm:$0xff]   ;;  %v469_v15 = vld [vmem:[%s649_s3 + $0x30] sm:$0xff]   ;;  %v458_v17 = vld [vmem:[%s647_s1 + $0x20] ss:$8 sps:$4 sm:$0xff]  }
   0x7   :  { %141 = vmatpush1.bf16.msra.mxu0 %v446_v4  ;;  %416 = vmatpush3.bf16.msra.mxu1 %v467_v12  ;;  %v471_v19 = vld [vmem:[%s649_s3 + $0x28] sm:$0xff]   ;;  %v472_v20 = vld [vmem:[%s649_s3 + $0x60] sm:$0xff]   ;;  %v461_v21 = vld [vmem:[%s647_s1 + $0x10] ss:$8 sps:$4 sm:$0xff]  }
   0x8   :  { %142 = vmatprep.subr.bf16.mxu0 %v447_v5  ;;  %417 = vmatprep.subr.bf16.mxu1 %v468_v14  ;;  %v473_v22 = vld [vmem:[%s649_s3 + $0x20] sm:$0xff]   ;;  %v474_v24 = vld [vmem:[%s649_s3 + $0x58] sm:$0xff]  }
   0x9   :  { %v462_v23 = vld [vmem:[%s647_s1 + $0x4] ss:$8 sps:$4 sm:$0xff]  }
   0xb   :  { %143 = vmatpush1.bf16.msra.mxu0 %v449_v6  ;;  %418 = vmatpush3.bf16.msra.mxu1 %v469_v15 }
   0xc   :  { %144 = vmatprep.subr.bf16.mxu0 %v450_v7  ;;  %419 = vmatprep.subr.bf16.mxu1 %v470_v16 }
   0xf   :  { %145 = vmatpush1.bf16.msra.mxu0 %v452_v8  ;;  %420 = vmatpush3.bf16.msra.mxu1 %v471_v19 }
  0x10   :  { %146 = vmatprep.subr.bf16.mxu0 %v453_v9  ;;  %421 = vmatprep.subr.bf16.mxu1 %v472_v20 }
  0x13   :  { %147 = vmatpush1.bf16.msra.mxu0 %v455_v11 }
  0x14   :  { %148 = vmatprep.subr.bf16.mxu0 %v456_v13 }
  0x17   :  { %149 = vmatpush1.bf16.msra.mxu0 %v458_v17 }
  0x18   :  { %150 = vmatprep.subr.bf16.mxu0 %v459_v18 }
  0x19   :  { %10 = vsyncpa [#allocation3], 0  ;;  %v464_v25 = vld [vmem:[%s647_s1] ss:$8 sps:$4 sm:$0xff]   ;;  %422 = vmatpush3.bf16.msra.mxu1 %v473_v22  ;;  %v475_v26 = vld [vmem:[%s649_s3 + $0x18] sm:$0xff]   ;;  %v42_v34 = vlaneseq  ;;  %s505_s9 = smov [#allocation2]  }
  0x1a   :  { %423 = vmatprep.subr.bf16.mxu1 %v474_v24  ;;  %v465_v27 = vld [vmem:[%s646_s0] sm:$0xff]   ;;  %v476_v28 = vld [vmem:[%s649_s3 + $0x50] sm:$0xff]   ;;  %v478_v30 = vld [vmem:[%s649_s3 + $0x48] sm:$0xff]   ;;  %s370_s10 = sshll.u32 %s505_s9, 4  ;;  %s371_s10 = int_to_ptr.vmem [resolvable:$true] %s370_s10 }
  0x1b   :  { %151 = vmatpush1.bf16.msra.mxu0 %v461_v21  ;;  %v477_v29 = vld [vmem:[%s649_s3 + $0x10] sm:$0xff]   ;;  %v479_v31 = vld [vmem:[%s649_s3 + $0x8] sm:$0xff]   ;;  %v480_v32 = vld [vmem:[%s649_s3 + $0x40] sm:$0xff]   ;;  %v43_v35 = vshrl.u32 %v42_v34, 7  ;;  %s482_s11 = scalar_lea.vmem %s371_s10, 256  ;;  %p487_p1 = scmp.lt.s32.totalorder %s371_s10, %s371_s10 }
  0x1c   :  { %152 = vmatprep.subr.bf16.mxu0 %v462_v23  ;;  %v481_v33 = vld [vmem:[%s649_s3] sm:$0xff]   ;;  %p483_p0 = scmp.ne.s32.totalorder %s371_s10, %s482_s11  ;;  %p488_p2 = scmp.lt.s32.totalorder %s482_s11, %s482_s11 }
  0x1d   :  { %424 = vmatpush3.bf16.msra.mxu1 %v475_v26  ;;  %v48_v36 = vsub.s32 1, %v43_v35  ;;  %v44_v37 = vsub.s32 0, %v43_v35  ;;  %v40_v38 = vld [vmem:[%s648_s2] sm:$0x3] }
  0x1e   :  { %425 = vmatprep.subr.bf16.mxu1 %v476_v28  ;;  %v398_v56 = vld [vmem:[%s650_s4] ss:$0 sm:$0xff]  ;;  %p489_p3 = por %p488_p2, %p487_p1 }
  0x1f   :  { %153 = vmatpush1.bf16.msra.mxu0 %v464_v25  ;;  %v49_v40 = vrot.slane %v40_v38, %v48_v36  ;;  %v45_v41 = vrot.slane %v40_v38, %v44_v37 }
  0x20   :  { %p490_p4 = pnand %p489_p3, %p483_p0 }
  0x21   :  { %426 = vmatpush3.bf16.msra.mxu1 %v477_v29 }
  0x22   :  { %171 = vmatmul.mubr.bf16.vlgmr.msra.gmra.mxu0 %v465_v27  ;;  %427 = vmatprep.subr.bf16.mxu1 %v478_v30 }
  0x25   :  { %428 = vmatpush3.bf16.msra.mxu1 %v479_v31 }
  0x26   :  { %429 = vmatprep.subr.bf16.mxu1 %v480_v32 }
  0x29   :  { %430 = vmatpush3.bf16.msra.mxu1 %v481_v33 }
  0xe2   :  { %v172_v39 = vpop.f32.mrf.mxu0 }
  0xe3   :  { %v173_v46 = vadd.f32 %v172_v39, %v45_v41 }
  0xe4   :  { %v174_v42 = vpop.f32.mrf.mxu0 }
  0xe5   :  { %v175_v44 = vadd.f32 %v174_v42, %v49_v40  ;;  %v181_v52 = vmax.f32 %v173_v46, 0.0 }
  0xe6   :  { %v176_v43 = vpop.f32.mrf.mxu0 }
  0xe7   :  { %v177_v45 = vadd.f32 %v176_v43, %v45_v41  ;;  %v182_v50 = vmax.f32 %v175_v44, 0.0 }
  0xe8   :  { %v178_v47 = vpop.f32.mrf.mxu0 }
  0xe9   :  { %v179_v48 = vadd.f32 %v178_v47, %v49_v40  ;;  %v183_v49 = vmax.f32 %v177_v45, 0.0 }
  0xeb   :  { %v184_v51 = vmax.f32 %v179_v48, 0.0  ;;  %v185_v54 = vpack.c.bf16 %v183_v49, %v181_v52 }
  0xed   :  { %v186_v53 = vpack.c.bf16 %v184_v51, %v182_v50 }
  0xef   :  { %354 = vmatprep.mubr.bf16.mxu1 %v186_v53 }
  0xf0   :  { %355 = vmatmul.mubr.bf16.vlgmr.msra.gmra.mxu1 %v185_v54 }
 0x1b0   :  { %v431_v55 = vpop.f32.mrf.mxu1 }
 0x1b2   :  { %v432_v57 = vpop.f32.mrf.mxu1 }
 0x1b3   :  { %v433_v58 = vadd.f32 %v432_v57, %v431_v55 }
 0x1b4   :  { %v434_v59 = vpop.f32.mrf.mxu1 }
 0x1b5   :  { %v357_v60 = vadd.f32 %v433_v58, %v398_v56 }
 0x1b6   :  { %v435_v61 = vpop.f32.mrf.mxu1 }
 0x1b7   :  { %363 = vst [vmem:[#allocation2] sm:$0xff] %v357_v60  ;;  %v436_v62 = vadd.f32 %v435_v61, %v434_v59 }
 0x1b9   :  { %v360_v63 = vadd.f32 %v436_v62, %v398_v56 }
 0x1bb   :  { %364 = vst [vmem:[#allocation2 + $0x8] sm:$0xff] %v360_v63 }
 0x1bc   :  { %493 = shalt.err (!%p490_p4)
}
 0x1bd   :  { %s506_s4 = smov 128   ;;  %s507_s12 = smov 8  }
 0x1be   :  { %376 = dma.vmem_to_hbm [thread:$0]  %s371_s10, 256, %s651_s5, [#allocation3], %s506_s4, %s506_s4, %s507_s12  }
 0x1bf   :  { %502 = dma.done.wait [#allocation3], 256  }
 0x1c0   :  { %503 = vsyncadd [#allocation3], 4294967040 }
 0x1c1   :  { %380 = vsyncpa [#allocation3], 1 }

</bundles_post_ra>
